<compile_context>
chip_gen: v5e
topology: v5e:2x2
jax: 0.10.0
libtpu: 0.0.40
codegen_flags: <defaults>
</compile_context>

<pallas_src>
import jax
import jax.numpy as jnp
from jax.experimental import pallas as pl
from jax.experimental.pallas import tpu as pltpu


def _physics_nn_kernel(x_ref, w1t_ref, b1_ref, w2c_ref, b2_ref,
                       w3r_ref, b3_ref, w4c_ref, b4_ref, o_ref):
    x = x_ref[...]                                                      # (TILE_M, 60)

    # extractor Linear(60 -> 10) + ReLU:  x @ W1^T  -> (TILE_M, 10)
    h1 = jnp.dot(x, w1t_ref[...], preferred_element_type=jnp.float32)   # (TILE_M, 10)
    h1 = jnp.maximum(h1 + b1_ref[...], 0.0)

    # extractor Linear(10 -> 1): contraction dim (10) already on lanes -> tiny MXU matmul.
    amb = jnp.dot(h1, w2c_ref[...], preferred_element_type=jnp.float32) + b2_ref[...]  # (TILE_M, 1)

    # classifier Linear(1 -> 10) + ReLU: in_features == 1, so it's a lane broadcast.
    h2 = jnp.maximum(amb * w3r_ref[...] + b3_ref[...], 0.0)             # (TILE_M, 10)

    # classifier Linear(10 -> 1) + Sigmoid.
    out = jnp.dot(h2, w4c_ref[...], preferred_element_type=jnp.float32) + b4_ref[...]  # (TILE_M, 1)
    o_ref[...] = jax.nn.sigmoid(out).astype(o_ref.dtype)


def _round_up(a, m):
    return ((a + m - 1) // m) * m


def _pick_tile(n, max_tile_m, min_steps=4):
    """Batch tile: >= min_steps grid steps (both v7x TCs busy), sublane-aligned."""
    if n <= 8:
        return n                          # full extent; satisfies BlockSpec rules
    t = _round_up(pl.cdiv(n, min_steps), 8)
    return min(t, max_tile_m)


def physics_aware_nn_forward(x, params, *, max_tile_m=8192):
    """x: (N, 60) float32.  Returns (N, 1) float32 sigmoid probabilities."""
    w1t, b1, w2c, b2, w3r, b3, w4c, b4 = (
        params[k] for k in ("w1t", "b1", "w2c", "b2", "w3r", "b3", "w4c", "b4"))
    n, in_features = x.shape
    assert in_features == 60

    tile_m = _pick_tile(n, max_tile_m)
    grid = (pl.cdiv(n, tile_m),)

    # Weights/biases: constant index_maps -> single DMA, VMEM-resident across steps.
    const2d = lambda a: pl.BlockSpec(a.shape, lambda i: (0, 0))

    param_bytes = 4 * sum(int(p.size) for p in (w1t, b1, w2c, b2, w3r, b3, w4c, b4))
    cost = pl.CostEstimate(
        flops=2 * n * (60 * 10 + 10 * 1 + 1 * 10 + 10 * 1),
        transcendentals=n,                          # one sigmoid per row
        bytes_accessed=n * (60 * 4 + 4) + param_bytes,
    )

    out = pl.pallas_call(
        _physics_nn_kernel,
        out_shape=jax.ShapeDtypeStruct((n, 1), jnp.float32),
        grid=grid,
        in_specs=[
            pl.BlockSpec((tile_m, 60), lambda i: (i, 0)),   # x: pipelined over batch
            const2d(w1t), const2d(b1),
            const2d(w2c), const2d(b2),
            const2d(w3r), const2d(b3),
            const2d(w4c), const2d(b4),
        ],
        out_specs=pl.BlockSpec((tile_m, 1), lambda i: (i, 0)),   # matches (N,1) directly
        compiler_params=pltpu.CompilerParams(
            dimension_semantics=("parallel",),
            vmem_limit_bytes=32 * 1024 * 1024,      # lane-padded buffers @8192 ~16 MiB
        ),
        cost_estimate=cost,
    )(x, w1t, b1, w2c, b2, w3r, b3, w4c, b4)

    return out


def init_params(key):
    """PyTorch nn.Linear default init: U(-1/sqrt(fan_in), 1/sqrt(fan_in)).

    Layouts (chosen for the batch-on-sublanes kernel):
      w1t (60, 10): Linear(60,10) weight, stored transposed (in, out)
      w2c (10, 1) : Linear(10,1) weight stored as a column (in, out)
      w3r (1, 10) : Linear(1,10) weight stored as a row (in, out)
      w4c (10, 1) : Linear(10,1) weight stored as a column (in, out)
      biases stored as (1, out) so they broadcast over the batch (sublane) dim.
    """
    specs = [
        ("w1t", "b1", 60, 10, (60, 10)),
        ("w2c", "b2", 10, 1, (10, 1)),
        ("w3r", "b3", 1, 10, (1, 10)),
        ("w4c", "b4", 10, 1, (10, 1)),
    ]
    params = {}
    keys = jax.random.split(key, 2 * len(specs))
    for i, (wname, bname, fan_in, fan_out, wshape) in enumerate(specs):
        bound = 1.0 / (fan_in ** 0.5)
        params[wname] = jax.random.uniform(keys[2 * i], wshape, jnp.float32, -bound, bound)
        params[bname] = jax.random.uniform(keys[2 * i + 1], (1, fan_out), jnp.float32,
                                           -bound, bound)
    return params


def _reference(x, p):
    """Plain-JAX forward identical to the PyTorch module."""
    h1 = jnp.maximum(x @ p["w1t"] + p["b1"], 0.0)        # (N, 10)
    amb = h1 @ p["w2c"] + p["b2"]                        # (N, 1)
    h2 = jnp.maximum(amb @ p["w3r"] + p["b3"], 0.0)      # (N, 10)
    return jax.nn.sigmoid(h2 @ p["w4c"] + p["b4"])       # (N, 1)


if __name__ == "__main__":
    key = jax.random.PRNGKey(0)
    k_x, k_x2, k_p = jax.random.split(key, 3)
    params = init_params(k_p)

    # Small single-block case.
    batch = 8
    x = jax.random.normal(k_x, (batch, 60), dtype=jnp.float32)
    out = jax.block_until_ready(physics_aware_nn_forward(x, params))
    ref = _reference(x, params)
    assert out.shape == (batch, 1)
    assert jnp.allclose(out, ref, atol=1e-5, rtol=1e-5)

    # Multi-step grid with a ragged final tile (exercises writeback masking).
    batch2 = 300
    x2 = jax.random.normal(k_x2, (batch2, 60), dtype=jnp.float32)
    out2 = jax.block_until_ready(physics_aware_nn_forward(x2, params, max_tile_m=128))
    ref2 = _reference(x2, params)
    assert out2.shape == (batch2, 1)
    assert jnp.allclose(out2, ref2, atol=1e-5, rtol=1e-5)

    print("KERNEL_OK")
</pallas_src>

<mosaic_0001>
module attributes {stable_mosaic.version = 11 : i64} {
  func.func @_physics_nn_kernel(%arg0: i32, %arg1: memref<8x60xf32, #tpu.memory_space<vmem>>, %arg2: memref<60x10xf32, #tpu.memory_space<vmem>>, %arg3: memref<1x10xf32, #tpu.memory_space<vmem>>, %arg4: memref<10x1xf32, #tpu.memory_space<vmem>>, %arg5: memref<1x1xf32, #tpu.memory_space<vmem>>, %arg6: memref<1x10xf32, #tpu.memory_space<vmem>>, %arg7: memref<1x10xf32, #tpu.memory_space<vmem>>, %arg8: memref<10x1xf32, #tpu.memory_space<vmem>>, %arg9: memref<1x1xf32, #tpu.memory_space<vmem>>, %arg10: memref<8x1xf32, #tpu.memory_space<vmem>>) attributes {dimension_semantics = [#tpu.dimension_semantics<parallel>], iteration_bounds = array<i64: 1>, scalar_prefetch = 0 : i64, scratch_operands = 0 : i64, tpu.core_type = #tpu.core_type<tc>, window_params = [{transform_indices = @transform_0, window_bounds = array<i64: 8, 60>}, {pipeline_mode = #tpu.pipeline_mode<synchronous>, transform_indices = @transform_1, window_bounds = array<i64: 60, 10>}, {pipeline_mode = #tpu.pipeline_mode<synchronous>, transform_indices = @transform_2, window_bounds = array<i64: 1, 10>}, {pipeline_mode = #tpu.pipeline_mode<synchronous>, transform_indices = @transform_3, window_bounds = array<i64: 10, 1>}, {pipeline_mode = #tpu.pipeline_mode<synchronous>, transform_indices = @transform_4, window_bounds = array<i64: 1, 1>}, {pipeline_mode = #tpu.pipeline_mode<synchronous>, transform_indices = @transform_5, window_bounds = array<i64: 1, 10>}, {pipeline_mode = #tpu.pipeline_mode<synchronous>, transform_indices = @transform_6, window_bounds = array<i64: 1, 10>}, {pipeline_mode = #tpu.pipeline_mode<synchronous>, transform_indices = @transform_7, window_bounds = array<i64: 10, 1>}, {pipeline_mode = #tpu.pipeline_mode<synchronous>, transform_indices = @transform_8, window_bounds = array<i64: 1, 1>}, {transform_indices = @transform_9, window_bounds = array<i64: 8, 1>}]} {
    %c0 = arith.constant 0 : index
    %c0_0 = arith.constant 0 : index
    %0 = vector.load %arg1[%c0, %c0_0] : memref<8x60xf32, #tpu.memory_space<vmem>>, vector<8x60xf32>
    %c0_1 = arith.constant 0 : index
    %c0_2 = arith.constant 0 : index
    %1 = vector.load %arg2[%c0_1, %c0_2] : memref<60x10xf32, #tpu.memory_space<vmem>>, vector<60x10xf32>
    %cst = arith.constant dense<0.000000e+00> : vector<8x10xf32>
    %2 = tpu.matmul %0, %1, %cst {dimension_numbers = #tpu.dot_dimension_numbers<[1], [0], [0], [1], [0, 0, 1, 1], [], []>} : vector<8x60xf32>, vector<60x10xf32>, vector<8x10xf32> -> vector<8x10xf32>
    %c0_3 = arith.constant 0 : index
    %c0_4 = arith.constant 0 : index
    %3 = vector.load %arg3[%c0_3, %c0_4] : memref<1x10xf32, #tpu.memory_space<vmem>>, vector<1x10xf32>
    %4 = vector.broadcast %3 : vector<1x10xf32> to vector<8x10xf32>
    %5 = arith.addf %2, %4 : vector<8x10xf32>
    %cst_5 = arith.constant 0.000000e+00 : f32
    %6 = vector.broadcast %cst_5 : f32 to vector<8x10xf32>
    %7 = arith.maximumf %5, %6 : vector<8x10xf32>
    %c0_6 = arith.constant 0 : index
    %c0_7 = arith.constant 0 : index
    %8 = vector.load %arg4[%c0_6, %c0_7] : memref<10x1xf32, #tpu.memory_space<vmem>>, vector<10x1xf32>
    %cst_8 = arith.constant dense<0.000000e+00> : vector<8x1xf32>
    %9 = tpu.matmul %7, %8, %cst_8 {dimension_numbers = #tpu.dot_dimension_numbers<[1], [0], [0], [1], [0, 0, 1, 1], [], []>} : vector<8x10xf32>, vector<10x1xf32>, vector<8x1xf32> -> vector<8x1xf32>
    %c0_9 = arith.constant 0 : index
    %c0_10 = arith.constant 0 : index
    %10 = vector.load %arg5[%c0_9, %c0_10] : memref<1x1xf32, #tpu.memory_space<vmem>>, vector<1x1xf32>
    %11 = vector.broadcast %10 : vector<1x1xf32> to vector<8x1xf32>
    %12 = arith.addf %9, %11 : vector<8x1xf32>
    %c0_11 = arith.constant 0 : index
    %c0_12 = arith.constant 0 : index
    %13 = vector.load %arg6[%c0_11, %c0_12] : memref<1x10xf32, #tpu.memory_space<vmem>>, vector<1x10xf32>
    %14 = vector.broadcast %12 : vector<8x1xf32> to vector<8x10xf32>
    %15 = vector.broadcast %13 : vector<1x10xf32> to vector<8x10xf32>
    %16 = arith.mulf %14, %15 : vector<8x10xf32>
    %c0_13 = arith.constant 0 : index
    %c0_14 = arith.constant 0 : index
    %17 = vector.load %arg7[%c0_13, %c0_14] : memref<1x10xf32, #tpu.memory_space<vmem>>, vector<1x10xf32>
    %18 = vector.broadcast %17 : vector<1x10xf32> to vector<8x10xf32>
    %19 = arith.addf %16, %18 : vector<8x10xf32>
    %cst_15 = arith.constant 0.000000e+00 : f32
    %20 = vector.broadcast %cst_15 : f32 to vector<8x10xf32>
    %21 = arith.maximumf %19, %20 : vector<8x10xf32>
    %c0_16 = arith.constant 0 : index
    %c0_17 = arith.constant 0 : index
    %22 = vector.load %arg8[%c0_16, %c0_17] : memref<10x1xf32, #tpu.memory_space<vmem>>, vector<10x1xf32>
    %cst_18 = arith.constant dense<0.000000e+00> : vector<8x1xf32>
    %23 = tpu.matmul %21, %22, %cst_18 {dimension_numbers = #tpu.dot_dimension_numbers<[1], [0], [0], [1], [0, 0, 1, 1], [], []>} : vector<8x10xf32>, vector<10x1xf32>, vector<8x1xf32> -> vector<8x1xf32>
    %c0_19 = arith.constant 0 : index
    %c0_20 = arith.constant 0 : index
    %24 = vector.load %arg9[%c0_19, %c0_20] : memref<1x1xf32, #tpu.memory_space<vmem>>, vector<1x1xf32>
    %25 = vector.broadcast %24 : vector<1x1xf32> to vector<8x1xf32>
    %26 = arith.addf %23, %25 : vector<8x1xf32>
    %27 = arith.negf %26 : vector<8x1xf32>
    %28 = math.exp %27 : vector<8x1xf32>
    %cst_21 = arith.constant 1.000000e+00 : f32
    %29 = vector.broadcast %cst_21 : f32 to vector<8x1xf32>
    %30 = arith.addf %29, %28 : vector<8x1xf32>
    %31 = arith.divf %29, %30 : vector<8x1xf32>
    %c0_22 = arith.constant 0 : index
    %c0_23 = arith.constant 0 : index
    %32 = vector.load %arg10[%c0_22, %c0_23] : memref<8x1xf32, #tpu.memory_space<vmem>>, vector<8x1xf32>
    tpu.vector_store %arg10[%c0_22, %c0_23], %31 {strides = array<i32>} : memref<8x1xf32, #tpu.memory_space<vmem>>, vector<8x1xf32>,
    return
  }
  func.func @transform_0(%arg0: i32) -> (i32, i32) {
    %c0_i32 = arith.constant 0 : i32
    %c0_i32_0 = arith.constant 0 : i32
    return %arg0, %c0_i32 : i32, i32
  }
  func.func @transform_1(%arg0: i32) -> (i32, i32) {
    %c0_i32 = arith.constant 0 : i32
    %c0_i32_0 = arith.constant 0 : i32
    %c0_i32_1 = arith.constant 0 : i32
    return %c0_i32, %c0_i32_0 : i32, i32
  }
  func.func @transform_2(%arg0: i32) -> (i32, i32) {
    %c0_i32 = arith.constant 0 : i32
    %c0_i32_0 = arith.constant 0 : i32
    %c0_i32_1 = arith.constant 0 : i32
    return %c0_i32, %c0_i32_0 : i32, i32
  }
  func.func @transform_3(%arg0: i32) -> (i32, i32) {
    %c0_i32 = arith.constant 0 : i32
    %c0_i32_0 = arith.constant 0 : i32
    %c0_i32_1 = arith.constant 0 : i32
    return %c0_i32, %c0_i32_0 : i32, i32
  }
  func.func @transform_4(%arg0: i32) -> (i32, i32) {
    %c0_i32 = arith.constant 0 : i32
    %c0_i32_0 = arith.constant 0 : i32
    %c0_i32_1 = arith.constant 0 : i32
    return %c0_i32, %c0_i32_0 : i32, i32
  }
  func.func @transform_5(%arg0: i32) -> (i32, i32) {
    %c0_i32 = arith.constant 0 : i32
    %c0_i32_0 = arith.constant 0 : i32
    %c0_i32_1 = arith.constant 0 : i32
    return %c0_i32, %c0_i32_0 : i32, i32
  }
  func.func @transform_6(%arg0: i32) -> (i32, i32) {
    %c0_i32 = arith.constant 0 : i32
    %c0_i32_0 = arith.constant 0 : i32
    %c0_i32_1 = arith.constant 0 : i32
    return %c0_i32, %c0_i32_0 : i32, i32
  }
  func.func @transform_7(%arg0: i32) -> (i32, i32) {
    %c0_i32 = arith.constant 0 : i32
    %c0_i32_0 = arith.constant 0 : i32
    %c0_i32_1 = arith.constant 0 : i32
    return %c0_i32, %c0_i32_0 : i32, i32
  }
  func.func @transform_8(%arg0: i32) -> (i32, i32) {
    %c0_i32 = arith.constant 0 : i32
    %c0_i32_0 = arith.constant 0 : i32
    %c0_i32_1 = arith.constant 0 : i32
    return %c0_i32, %c0_i32_0 : i32, i32
  }
  func.func @transform_9(%arg0: i32) -> (i32, i32) {
    %c0_i32 = arith.constant 0 : i32
    %c0_i32_0 = arith.constant 0 : i32
    return %arg0, %c0_i32 : i32, i32
  }
}

</mosaic_0001>

<bundles_post_ra>
// kernel: tpu_custom_call.1
= control target key start
LH: loop header
LB: loop body
LE: loop exit
PB: predicated region body
PF: predicated region fallthrough
CT: control target
= control target key end

     0   :  { %vm53_vm0 = vcmask 1043456   ;;  %vm49_vm1 = vcmask 490496   ;;  %vm88_vm2 = vcmask 1041408   ;;  %vm84_vm3 = vcmask 80896   ;;  %s315_s1 = inlined_call_operand.vmem [shape: f32[60,10], index: 1, kind: input, shape index: {}]   ;;  %s316_s2 = inlined_call_operand.vmem [shape: f32[1,10], index: 2, kind: input, shape index: {}]   ;;  %s317_s0 = inlined_call_operand.vmem [shape: f32[8,60], index: 0, kind: input, shape index: {}]   ;;  %s318_s3 = inlined_call_operand.vmem [shape: f32[10,1], index: 3, kind: input, shape index: {}]   ;;  %s319_s4 = inlined_call_operand.<no memory space> [shape: f32[1,1], index: 4, kind: input, shape index: {}]   ;;  %s320_s5 = inlined_call_operand.vmem [shape: f32[1,10], index: 5, kind: input, shape index: {}]   ;;  %s321_s6 = inlined_call_operand.vmem [shape: f32[1,10], index: 6, kind: input, shape index: {}]   ;;  %s322_s7 = inlined_call_operand.vmem [shape: f32[10,1], index: 7, kind: input, shape index: {}]   ;;  %s323_s8 = inlined_call_operand.<no memory space> [shape: f32[1,1], index: 8, kind: input, shape index: {}]   ;;  %s324_s9 = inlined_call_operand.vmem [shape: f32[8,1], index: 9, kind: output, shape index: {}]  }
   0x1   :  { %v44_v0 = vld [vmem:[%s315_s1 + $0x38] sm:$0xf]  ;;  %v43_v1 = vld [vmem:[%s315_s1 + $0x30] sm:$0xff]  ;;  %v42_v2 = vld [vmem:[%s315_s1 + $0x28] sm:$0xff]  ;;  %v14_v11 = vstv %s319_s4  ;;  %v203_v16 = vmov 0   ;;  %vm179_vm7 = vcmask 7168  }
   0x2   :  { %185 = vmatpush.msk.msra.mxu0 %vm53_vm0, %v44_v0  ;;  %v41_v3 = vld [vmem:[%s315_s1 + $0x20] sm:$0xff]  ;;  %v40_v4 = vld [vmem:[%s315_s1 + $0x18] sm:$0xff]  ;;  %v39_v5 = vld [vmem:[%s315_s1 + $0x10] sm:$0xff]  ;;  %15 = vst [vmem:[#allocation2] sm:$0x1] %v14_v11  ;;  %193 = vset.pattern.permute.xlu0 %v203_v16  ;;  %v16_v22 = vstv %s323_s8 }
   0x3   :  { %v38_v6 = vld [vmem:[%s315_s1 + $0x8] sm:$0xff]  ;;  %v37_v7 = vld [vmem:[%s315_s1] sm:$0xff]  ;;  %17 = vst [vmem:[#allocation3] sm:$0x1] %v16_v22 }
   0x4   :  { %66 = vmatpush.msra.mxu0 %v43_v1  ;;  %v36_v8 = vld [vmem:[%s317_s0] sm:$0xff]  ;;  %v79_v9 = vld [vmem:[%s318_s3 + $0x8] sm:$0x3] }
   0x5   :  { %187 = vmatpush.msk.msra.mxu1 %vm88_vm2, %v79_v9  ;;  %v78_v10 = vld [vmem:[%s318_s3] sm:$0xff]  ;;  %v129_v20 = vld [vmem:[%s322_s7 + $0x8] sm:$0x3] }
   0x6   :  { %67 = vmatpush.msra.mxu0 %v42_v2  ;;  %v194_v12 = vld [vmem:[%s316_s2] ss:$0 sm:$0xff]  ;;  %189 = vmatpush.msk.msra.mxu2 %vm88_vm2, %v129_v20 }
   0x7   :  { %107 = vmatpush.msra.mxu1 %v78_v10  ;;  %v128_v21 = vld [vmem:[%s322_s7] sm:$0xff] }
   0x8   :  { %68 = vmatpush.msra.mxu0 %v41_v3  ;;  %155 = vmatpush.msra.mxu2 %v128_v21  ;;  %v196_v23 = vld [vmem:[%s320_s5] ss:$0 sm:$0xff] }
   0x9   :  { %v195_v17 = vld [vmem:[#allocation2] ss:$0 sm:$0xff] }
   0xa   :  { %69 = vmatpush.msra.mxu0 %v40_v4  ;;  %v197_v24 = vld [vmem:[%s321_s6] ss:$0 sm:$0xff]  ;;  %v198_v29 = vld [vmem:[#allocation3] ss:$0 sm:$0xff] }
   0xc   :  { %70 = vmatpush.msra.mxu0 %v39_v5 }
   0xe   :  { %71 = vmatpush.msra.mxu0 %v38_v6 }
  0x10   :  { %72 = vmatpush.msra.mxu0 %v37_v7 }
  0x11   :  { %186 = vmatmul.msk.f32.vlgmr.msra.gmra.mxu0 %vm49_vm1, %v36_v8 }
  0x8e   :  { %v74_v13 = vpop.f32.mrf.mxu0 }
  0x8f   :  { %v75_v14 = vadd.f32 %v194_v12, %v74_v13 }
  0x91   :  { %v77_v15 = vmax.f32 %v75_v14, 0.0 }
  0x93   :  { %188 = vmatmul.msk.f32.vlgmr.msra.gmra.mxu1 %vm84_vm3, %v77_v15 }
 0x110   :  { %v109_v18 = vpop.f32.mrf.mxu1 }
 0x111   :  { %v110_v19 = vadd.f32 %v195_v17, %v109_v18 }
 0x113   :  { %115 = vperm.xlu0 %193, %v110_v19  }
 0x185   :  { %v116_v25 = vpop.permute.xlu0 %115 }
 0x186   :  { %v121_v26 = vmul.f32 %v196_v23, %v116_v25 }
 0x188   :  { %v126_v27 = vadd.f32 %v197_v24, %v121_v26 }
 0x18a   :  { %v127_v28 = vmax.f32 %v126_v27, 0.0 }
 0x18c   :  { %190 = vmatmul.msk.f32.vlgmr.msra.gmra.mxu2 %vm84_vm3, %v127_v28 }
 0x20f   :  { %v157_v30 = vpop.f32.mrf.mxu2 }
 0x210   :  { %v158_v31 = vadd.f32 %v198_v29, %v157_v30 }
 0x212   :  { %v191_v32 = vmul.f32 -1.442695, %v158_v31 }
 0x214   :  { %199 = vpow2.f32 %v191_v32 }
 0x21a   :  { %v200_v33 = vpop.eup %199 }
 0x21b   :  { %v163_v34 = vadd.f32 1.0, %v200_v33 }
 0x21d   :  { %201 = vrcp.f32 %v163_v34  ;;  %v175_v38 = vand.u32 2147483648, %v163_v34  ;;  %v173_v40 = vand.u32 2147483647, %v163_v34  ;;  %vm169_vm5 = vweird.f32 %v163_v34 }
 0x21f   :  { %v176_v42 = vor.u32 1.1754944e-38, %v175_v38  ;;  %vm174_vm8 = vcmp.eq.f32.partialorder %v173_v40, 8.507059e+37 }
 0x223   :  { %v202_v35 = vpop.eup %201 }
 0x224   :  { %v165_v36 = vmul.f32 %v202_v35, %v163_v34  ;;  %vm170_vm4 = vweird.f32 %v202_v35 }
 0x225   :  { %vm171_vm6 = vmor %vm169_vm5, %vm170_vm4 }
 0x226   :  { %v166_v37 = vsub.f32 1.0, %v165_v36 }
 0x228   :  { %v167_v39 = vmul.f32 %v202_v35, %v166_v37 }
 0x22a   :  { %v168_v41 = vadd.f32 %v202_v35, %v167_v39 }
 0x22c   :  { %v172_v43 = vsel %vm171_vm6, %v202_v35, %v168_v41 }
 0x22d   :  { %v177_v44 = vsel %vm174_vm8, %v176_v42, %v172_v43 }
 0x22e   :  { %180 = vst.msk [vmem:[%s324_s9] sm:$0xff] %vm179_vm7, %v177_v44 }

</bundles_post_ra>
